<compile_context>
chip_gen: v7x
topology: tpu7x:2x2x1
jax: 0.10.0
libtpu: 0.0.40
codegen_flags: <defaults>
</compile_context>

<pallas_src>
import math

import jax
import jax.numpy as jnp
from jax.experimental import pallas as pl
from jax.experimental.pallas import tpu as pltpu


def _groupwise_linear_kernel(x_ref, w_ref, b_ref, o_ref):
    # x_ref: (TB, C, D) block of batch rows
    # w_ref: (C, D) shared weights (VMEM-resident across the grid)
    # b_ref: (1, C) shared bias
    # o_ref: (TB, C) output block
    x = x_ref[...].astype(jnp.float32)          # upcast (no-op for f32 inputs)
    w = w_ref[...].astype(jnp.float32)
    prod = x * w[None, :, :]                    # VPU multiply, (TB, C, D)
    s = jnp.sum(prod, axis=-1)                  # XLU lane-reduce, f32 accumulation
    o_ref[...] = (s + b_ref[...].astype(jnp.float32)).astype(o_ref.dtype)


def groupwise_linear(x, W, b, *, block_b=None, compute_dtype=None):
    """x: (B, C, D); W: (1, C, D); b: (1, C). Returns (B, C) in x.dtype.

    block_b: rows of x per grid step (auto-sized from a VMEM budget if None).
    compute_dtype: optional streaming dtype for x/W (e.g. jnp.bfloat16);
                   the reduction always accumulates in f32.
    """
    B, C, D = x.shape
    out_dtype = x.dtype
    w2d = jnp.reshape(W, (C, D))
    b2d = jnp.reshape(b, (1, C)).astype(jnp.float32)

    if compute_dtype is not None:
        x = x.astype(compute_dtype)
        w2d = w2d.astype(compute_dtype)

    itemsize = jnp.dtype(x.dtype).itemsize

    if block_b is None:
        # ~24 MiB budget for the double-buffered x tile; leaves headroom under
        # the 48 MiB scoped-VMEM limit set below (safe on v5e/v6e/v7x).
        budget = 24 * 1024 * 1024
        tb = budget // max(1, 2 * C * D * itemsize)
        tb = max(8, min(int(tb), 256))
        tb = (tb // 8) * 8
    else:
        tb = int(block_b)

    if tb >= B:
        # Single grid step covering the whole batch: block dims equal full array
        # dims, so no (8,128) divisibility constraint and no padding needed.
        tb = B
        b_pad = B
        x_p = x
    else:
        tb = max(8, (tb // 8) * 8)              # sublane-aligned partial blocks
        n_blk = -(-B // tb)
        b_pad = n_blk * tb
        x_p = x if b_pad == B else jnp.pad(x, ((0, b_pad - B), (0, 0), (0, 0)))

    grid = (b_pad // tb,)

    flops = 2 * B * C * D
    bytes_accessed = (x.size * itemsize
                      + w2d.size * itemsize
                      + b2d.size * 4
                      + B * C * jnp.dtype(out_dtype).itemsize)

    out = pl.pallas_call(
        _groupwise_linear_kernel,
        out_shape=jax.ShapeDtypeStruct((b_pad, C), out_dtype),
        grid_spec=pltpu.PrefetchScalarGridSpec(
            num_scalar_prefetch=0,
            grid=grid,
            in_specs=[
                pl.BlockSpec((tb, C, D), lambda i: (i, 0, 0)),   # x: TB batch rows
                pl.BlockSpec((C, D), lambda i: (0, 0)),          # W: full, reused
                pl.BlockSpec((1, C), lambda i: (0, 0)),          # b: full, reused
            ],
            out_specs=pl.BlockSpec((tb, C), lambda i: (i, 0)),
        ),
        compiler_params=pltpu.CompilerParams(
            dimension_semantics=("parallel",),
            vmem_limit_bytes=48 * 1024 * 1024,
        ),
        cost_estimate=pl.CostEstimate(
            flops=flops, transcendentals=0, bytes_accessed=bytes_accessed),
    )(x_p, w2d, b2d)

    return out[:B]


def init_params(key, num_class, hidden_dim):
    """Deterministic init matching PyTorch reset_parameters (uniform(-stdv, stdv))."""
    stdv = 1.0 / math.sqrt(hidden_dim)
    kw, kb = jax.random.split(key)
    W = jax.random.uniform(kw, (1, num_class, hidden_dim),
                           minval=-stdv, maxval=stdv, dtype=jnp.float32)
    b = jax.random.uniform(kb, (1, num_class),
                           minval=-stdv, maxval=stdv, dtype=jnp.float32)
    return W, b


if __name__ == "__main__":
    key = jax.random.PRNGKey(0)
    k_param, k_x = jax.random.split(key)

    B, num_class, hidden_dim = 2, 8, 32
    W, bias = init_params(k_param, num_class, hidden_dim)
    x = jax.random.normal(k_x, (B, num_class, hidden_dim), dtype=jnp.float32)

    # f32 path, single grid step (block covers the full small batch).
    out = jax.block_until_ready(groupwise_linear(x, W, bias))
    ref = jnp.sum(W * x, axis=-1) + bias
    assert out.shape == (B, num_class)
    assert jnp.allclose(out, ref, atol=1e-5, rtol=1e-5), "f32 mismatch vs reference"

    # Multi-step tiled path: forces grid > 1 plus tail padding (B=20, TB=8).
    B2 = 20
    x2 = jax.random.normal(jax.random.PRNGKey(1), (B2, num_class, hidden_dim),
                           dtype=jnp.float32)
    ref2 = jnp.sum(W * x2, axis=-1) + bias
    out2 = jax.block_until_ready(groupwise_linear(x2, W, bias, block_b=8))
    assert out2.shape == (B2, num_class)
    assert jnp.allclose(out2, ref2, atol=1e-5, rtol=1e-5), "tiled mismatch vs reference"

    # bf16-streaming path (halved HBM traffic), f32 accumulation, looser tolerance.
    out_bf = jax.block_until_ready(
        groupwise_linear(x2, W, bias, compute_dtype=jnp.bfloat16))
    assert jnp.allclose(out_bf, ref2, atol=2e-2, rtol=2e-2), "bf16 mismatch vs reference"

    print("KERNEL_OK")
</pallas_src>

<mosaic_0001>
module attributes {stable_mosaic.version = 11 : i64} {
  func.func @_groupwise_linear_kernel(%arg0: i32, %arg1: memref<2x8x32xf32, #tpu.memory_space<vmem>>, %arg2: memref<8x32xf32, #tpu.memory_space<vmem>>, %arg3: memref<1x8xf32, #tpu.memory_space<vmem>>, %arg4: memref<2x8xf32, #tpu.memory_space<vmem>>) attributes {dimension_semantics = [#tpu.dimension_semantics<parallel>], iteration_bounds = array<i64: 1>, scalar_prefetch = 0 : i64, scratch_operands = 0 : i64, tpu.core_type = #tpu.core_type<tc>, window_params = [{transform_indices = @transform_0, window_bounds = array<i64: 2, 8, 32>}, {pipeline_mode = #tpu.pipeline_mode<synchronous>, transform_indices = @transform_1, window_bounds = array<i64: 8, 32>}, {pipeline_mode = #tpu.pipeline_mode<synchronous>, transform_indices = @transform_2, window_bounds = array<i64: 1, 8>}, {transform_indices = @transform_3, window_bounds = array<i64: 2, 8>}]} {
    %c0 = arith.constant 0 : index
    %c0_0 = arith.constant 0 : index
    %c0_1 = arith.constant 0 : index
    %0 = vector.load %arg1[%c0, %c0_0, %c0_1] : memref<2x8x32xf32, #tpu.memory_space<vmem>>, vector<2x8x32xf32>
    %c0_2 = arith.constant 0 : index
    %c0_3 = arith.constant 0 : index
    %1 = vector.load %arg2[%c0_2, %c0_3] : memref<8x32xf32, #tpu.memory_space<vmem>>, vector<8x32xf32>
    %2 = vector.shape_cast %1 : vector<8x32xf32> to vector<1x8x32xf32>
    %3 = vector.broadcast %2 : vector<1x8x32xf32> to vector<2x8x32xf32>
    %4 = arith.mulf %0, %3 : vector<2x8x32xf32>
    %cst = arith.constant dense<0.000000e+00> : vector<2x8xf32>
    %5 = vector.multi_reduction <add>, %4, %cst [2] : vector<2x8x32xf32> to vector<2x8xf32>
    %c0_4 = arith.constant 0 : index
    %c0_5 = arith.constant 0 : index
    %6 = vector.load %arg3[%c0_4, %c0_5] : memref<1x8xf32, #tpu.memory_space<vmem>>, vector<1x8xf32>
    %7 = vector.broadcast %6 : vector<1x8xf32> to vector<2x8xf32>
    %8 = arith.addf %5, %7 : vector<2x8xf32>
    %c0_6 = arith.constant 0 : index
    %c0_7 = arith.constant 0 : index
    %9 = vector.load %arg4[%c0_6, %c0_7] : memref<2x8xf32, #tpu.memory_space<vmem>>, vector<2x8xf32>
    tpu.vector_store %arg4[%c0_6, %c0_7], %8 {strides = array<i32>} : memref<2x8xf32, #tpu.memory_space<vmem>>, vector<2x8xf32>,
    return
  }
  func.func @transform_0(%arg0: i32) -> (i32, i32, i32) {
    %c0_i32 = arith.constant 0 : i32
    %c0_i32_0 = arith.constant 0 : i32
    %c0_i32_1 = arith.constant 0 : i32
    return %arg0, %c0_i32, %c0_i32_0 : i32, i32, i32
  }
  func.func @transform_1(%arg0: i32) -> (i32, i32) {
    %c0_i32 = arith.constant 0 : i32
    %c0_i32_0 = arith.constant 0 : i32
    %c0_i32_1 = arith.constant 0 : i32
    return %c0_i32, %c0_i32_0 : i32, i32
  }
  func.func @transform_2(%arg0: i32) -> (i32, i32) {
    %c0_i32 = arith.constant 0 : i32
    %c0_i32_0 = arith.constant 0 : i32
    %c0_i32_1 = arith.constant 0 : i32
    return %c0_i32, %c0_i32_0 : i32, i32
  }
  func.func @transform_3(%arg0: i32) -> (i32, i32) {
    %c0_i32 = arith.constant 0 : i32
    %c0_i32_0 = arith.constant 0 : i32
    return %arg0, %c0_i32 : i32, i32
  }
}

</mosaic_0001>

<bundles_post_ra>
// kernel: tpu_custom_call.1
= control target key start
LH: loop header
LB: loop body
LE: loop exit
PB: predicated region body
PF: predicated region fallthrough
CT: control target
= control target key end

     0   :  { %8 = vsyncpa [#allocation3], 0  ;;  %s250_s0 = inlined_call_operand.hbm [shape: f32[2,8,32], index: 0, kind: input, shape index: {}]   ;;  %s251_s1 = inlined_call_operand.hbm [shape: f32[8,32], index: 1, kind: input, shape index: {}]   ;;  %s252_s2 = inlined_call_operand.vmem [shape: f32[1,8], index: 2, kind: input, shape index: {}]   ;;  %s253_s3 = inlined_call_operand.hbm [shape: f32[2,8], index: 3, kind: output, shape index: {}]  }
   0x1   :  { %9 = vsyncpa [#allocation6], 0 }
   0x2   :  { %10 = vsyncpa [#allocation4], 0  ;;  %s185_s12 = smov [#allocation2]   ;;  %s113_s16 = scalar_lea.hbm %s250_s0, 256 }
   0x3   :  { %s16_s13 = sshll.u32 %s185_s12, 4  ;;  %p114_p0 = scmp.ne.s32.totalorder %s250_s0, %s113_s16  ;;  %s17_s13 = int_to_ptr.vmem [resolvable:$true] %s16_s13 }
   0x4   :  { %p117_p1 = scmp.lt.u32.totalorder %s113_s16, %s250_s0 }
   0x6   :  { %p119_p2 = pnand %p117_p1, %p114_p0 }
   0x8   :  { %122 = shalt.err (!%p119_p2)
}
   0x9   :  { %s123_s21 = scalar_lea.vmem %s17_s13, 256  ;;  %p128_p4 = scmp.lt.s32.totalorder %s17_s13, %s17_s13 }
   0xa   :  { %p124_p3 = scmp.ne.s32.totalorder %s17_s13, %s123_s21  ;;  %p129_p5 = scmp.lt.s32.totalorder %s123_s21, %s123_s21 }
   0xc   :  { %p130_p6 = por %p129_p5, %p128_p4 }
   0xe   :  { %p131_p7 = pnand %p130_p6, %p124_p3 }
  0x10   :  { %134 = shalt.err (!%p131_p7)
}
  0x11   :  { %s186_s22 = smov 128   ;;  %s187_s23 = smov 8  }
  0x12   :  { %22 = dma.hbm_to_vmem [thread:$0]  %s250_s0, 256, %s17_s13, [#allocation3], %s186_s22, %s186_s22, %s187_s23  }
  0x13   :  { %s188_s26 = smov [#allocation5]   ;;  %s135_s30 = scalar_lea.hbm %s251_s1, 128 }
  0x14   :  { %s29_s27 = sshll.u32 %s188_s26, 4  ;;  %p136_p8 = scmp.ne.s32.totalorder %s251_s1, %s135_s30  ;;  %s30_s27 = int_to_ptr.vmem [resolvable:$true] %s29_s27 }
  0x15   :  { %p139_p9 = scmp.lt.u32.totalorder %s135_s30, %s251_s1 }
  0x17   :  { %p141_p10 = pnand %p139_p9, %p136_p8 }
  0x19   :  { %144 = shalt.err (!%p141_p10)
}
  0x1a   :  { %s145_s8 = scalar_lea.vmem %s30_s27, 128  ;;  %p150_p12 = scmp.lt.s32.totalorder %s30_s27, %s30_s27 }
  0x1b   :  { %p146_p11 = scmp.ne.s32.totalorder %s30_s27, %s145_s8  ;;  %p151_p13 = scmp.lt.s32.totalorder %s145_s8, %s145_s8 }
  0x1d   :  { %p152_p0 = por %p151_p13, %p150_p12 }
  0x1f   :  { %p153_p1 = pnand %p152_p0, %p146_p11 }
  0x21   :  { %156 = shalt.err (!%p153_p1)
}
  0x22   :  { %32 = dma.hbm_to_vmem [thread:$0]  %s251_s1, 128, %s30_s27, [#allocation6]  }
  0x23   :  { %179 = dma.done.wait [#allocation3], 256  }
  0x24   :  { %180 = vsyncadd [#allocation3], 4294967040 }
  0x25   :  { %181 = dma.done.wait [#allocation6], 128  }
  0x26   :  { %182 = vsyncadd [#allocation6], 4294967168  ;;  %v41_v0 = vld [vmem:[#allocation2] sm:$0xff]  ;;  %v43_v1 = vld [vmem:[#allocation5] sm:$0xff]  ;;  %vm46_vm0 = vcmask 261120   ;;  %v189_v8 = vmov 0   ;;  %v73_v14 = vlaneseq }
  0x27   :  { %v42_v2 = vld [vmem:[#allocation2 + $0x8] sm:$0xff]  ;;  %v44_v3 = vmul.f32 %v43_v1, %v41_v0  ;;  %v104_v5 = vld [vmem:[%s252_s2] ss:$0 sm:$0xff]  ;;  %111 = vset.pattern.permute.xlu1 %v189_v8  ;;  %112 = vset.pattern.permute.xlu0 %v189_v8  ;;  %s190_s1 = smov [#allocation7]   ;;  %vm83_vm1 = vcmask 1041409   ;;  %vm86_vm2 = vcmask 58368  }
  0x28   :  { %v45_v4 = vmul.f32 %v43_v1, %v42_v2  ;;  %60 = vbcast.lane.b32.xlu1 %v104_v5, 256  ;;  %v74_v15 = vand.u32 127, %v73_v14  ;;  %v76_v16 = vshrl.u32 %v73_v14, 7  ;;  %s94_s2 = sshll.u32 %s190_s1, 4  ;;  %s95_s2 = int_to_ptr.vmem [resolvable:$true] %s94_s2 }
  0x29   :  { %v47_v6 = vsel %vm46_vm0, %v44_v3, 0.0  ;;  %s157_s12 = scalar_lea.vmem %s95_s2, 32  ;;  %p162_p3 = scmp.lt.s32.totalorder %s95_s2, %s95_s2 }
  0x2a   :  { %48 = vadd.xlane.f32.xlu0 %v47_v6  ;;  %v50_v7 = vsel %vm46_vm0, %v45_v4, 0.0  ;;  %v77_v17 = vsub.s32 %v74_v15, %v76_v16  ;;  %p158_p2 = scmp.ne.s32.totalorder %s95_s2, %s157_s12  ;;  %p163_p4 = scmp.lt.s32.totalorder %s157_s12, %s157_s12 }
  0x2c   :  { %p164_p5 = por %p163_p4, %p162_p3 }
  0x2e   :  { %51 = vadd.xlane.f32.xlu0 %v50_v7  ;;  %p165_p6 = pnand %p164_p5, %p158_p2 }
  0x9a   :  { %v61_v9 = vpop.permute.xlu1 %60 }
  0xb7   :  { %v49_v10 = vpop.xlane.xlu0 %48 }
  0xb8   :  { %v63_v11 = vadd.f32 %v61_v9, %v49_v10 }
  0xba   :  { %68 = vperm.xlu1 %111, %v63_v11  }
  0xbb   :  { %v52_v12 = vpop.xlane.xlu0 %51 }
  0xbc   :  { %v64_v13 = vadd.f32 %v61_v9, %v52_v12 }
  0xbe   :  { %71 = vperm.xlu0 %112, %v64_v13  }
 0x139   :  { %v69_v18 = vpop.permute.xlu1 %68 }
 0x13a   :  { %v78_v20 = vrot.slane %v69_v18, %v77_v17 }
 0x13d   :  { %v72_v19 = vpop.permute.xlu0 %71 }
 0x13e   :  { %v82_v21 = vrot.slane %v72_v19, %v77_v17 }
 0x140   :  { %v84_v22 = vsel %vm83_vm1, %v82_v21, %v78_v20 }
 0x141   :  { %87 = vst.msk [vmem:[#allocation7] sm:$0x3] %vm86_vm2, %v84_v22 }
 0x142   :  { %168 = shalt.err (!%p165_p6)
}
 0x143   :  { %s169_s15 = scalar_lea.hbm %s253_s3, 32 }
 0x144   :  { %p170_p7 = scmp.ne.s32.totalorder %s253_s3, %s169_s15  ;;  %p173_p8 = scmp.lt.u32.totalorder %s169_s15, %s253_s3 }
 0x146   :  { %p175_p9 = pnand %p173_p8, %p170_p7 }
 0x148   :  { %178 = shalt.err (!%p175_p9)
}
 0x149   :  { %97 = dma.vmem_to_hbm [thread:$0]  %s95_s2, 32, %s253_s3, [#allocation4]  }
 0x14a   :  { %183 = dma.done.wait [#allocation4], 32  }
 0x14b   :  { %184 = vsyncadd [#allocation4], 4294967264 }
 0x14c   :  { %101 = vsyncpa [#allocation3], 1 }
 0x14d   :  { %102 = vsyncpa [#allocation6], 1 }
 0x14e   :  { %103 = vsyncpa [#allocation4], 1 }

</bundles_post_ra>
